<compile_context>
chip_gen: v5e
topology: v5e:2x2
jax: 0.10.0
libtpu: 0.0.40
codegen_flags: <defaults>
</compile_context>

<pallas_src>
import jax
import jax.numpy as jnp
from jax import lax
from jax.experimental import pallas as pl
from jax.experimental.pallas import tpu as pltpu

# --- small config consistent with the module's __init__ ---------------------
VOCAB     = 50
VOCAB_PAD = 64      # one-hot / fused-table rows padded to a nice MXU size
EMB       = 32      # embedding_dim
HID       = 32      # hidden_size
LAYERS    = 2       # n_layers
CLASSES   = 3       # n_classes
BATCH     = 2       # real batch (demo)
BTILE     = 8       # batch rows per grid step = one full sublane group
SEQ       = 8
LN_EPS    = 1e-5

# row offsets inside the packed bf16 weight slab (all 32 columns wide)
ROW_TAB = 0                       # fused embedding table (VOCAB_PAD rows)
ROW_HH0 = ROW_TAB + VOCAB_PAD     # 64   W_hh layer 0
ROW_IH1 = ROW_HH0 + HID           # 96   W_ih layer 1
ROW_HH1 = ROW_IH1 + HID           # 128  W_hh layer 1
ROW_W1  = ROW_HH1 + HID           # 160  fc1 weight, cols padded 16 -> 32
ROW_W2  = ROW_W1 + HID            # 192  fc2 weight, padded (16,3) -> (32,32)
W_SLAB_ROWS = ROW_W2 + HID        # 224


# --- Pallas kernel: fused embedding + pipelined 2-layer RNN + head ----------
def sentiment_kernel(tok_ref, w_ref, v_ref, out_ref):
    # tok_ref : (SEQ*BTILE, 1) int32, time-major rows (row = t*BTILE + b)
    # w_ref   : (224, 32) bf16 packed weight slab
    # v_ref   : (8, 32)   f32 packed small-vector slab
    TB = SEQ * BTILE

    # Fused embedding lookup + layer-0 input projection + layer-0 biases:
    # exact one-hot selection of the precomputed fused table on the MXU.
    tok = tok_ref[...]                                              # (TB, 1)
    vocab_ids = lax.broadcasted_iota(jnp.int32, (TB, VOCAB_PAD), 1)
    onehot = (tok == vocab_ids).astype(jnp.float32).astype(jnp.bfloat16)
    table = w_ref[ROW_TAB:ROW_TAB + VOCAB_PAD, :]                   # (64, H) bf16
    pre0 = jnp.dot(onehot, table, preferred_element_type=jnp.float32)  # (TB, H) f32

    w_hh0 = w_ref[ROW_HH0:ROW_HH0 + HID, :]
    w_ih1 = w_ref[ROW_IH1:ROW_IH1 + HID, :]
    w_hh1 = w_ref[ROW_HH1:ROW_HH1 + HID, :]
    w1    = w_ref[ROW_W1:ROW_W1 + HID, :]
    w2    = w_ref[ROW_W2:ROW_W2 + HID, :]

    v    = v_ref[...]
    b_l1 = v[0:1, :]
    ln_g = v[1:2, :]
    ln_b = v[2:3, :]
    b1   = v[3:4, :]   # cols 16.. are zero
    b2   = v[4:5, :]   # cols CLASSES.. are zero

    def bdot(a, w):    # single-pass bf16 MXU matmul, f32 accumulation
        return jnp.dot(a.astype(jnp.bfloat16), w,
                       preferred_element_type=jnp.float32)

    # Interleaved (software-pipelined) two-layer recurrence: at iteration t,
    # layer-0 produces h0[t] while layer-1 consumes h0[t-1] -- the two chains
    # are independent within an iteration, so the scheduler overlaps them.
    h0 = jnp.zeros((BTILE, HID), jnp.float32)
    h1 = jnp.zeros((BTILE, HID), jnp.float32)
    for t in range(SEQ):                                   # static unroll, T=8
        if t == 0:
            h0_new = jnp.tanh(pre0[0:BTILE, :])            # h0[-1] == 0
        else:
            h0_new = jnp.tanh(pre0[t * BTILE:(t + 1) * BTILE, :]
                              + bdot(h0, w_hh0))
        if t == 1:                                         # layer-1 at time 0
            h1 = jnp.tanh(b_l1 + bdot(h0, w_ih1))          # h1[-1] == 0
        elif t > 1:                                        # layer-1 at time t-1
            h1 = jnp.tanh(b_l1 + bdot(h0, w_ih1) + bdot(h1, w_hh1))
        h0 = h0_new
    # epilogue: layer-1 at the final timestep consumes h0[T-1]
    h1 = jnp.tanh(b_l1 + bdot(h0, w_ih1) + bdot(h1, w_hh1))

    # LayerNorm over the hidden dim (h1 == rnn output at the last timestep)
    mean = jnp.mean(h1, axis=-1, keepdims=True)
    var = jnp.mean((h1 - mean) ** 2, axis=-1, keepdims=True)
    hn = (h1 - mean) * lax.rsqrt(var + LN_EPS)
    hn = hn * ln_g + ln_b

    # TODO(synk): dropout is identity in eval mode; no RNG mask applied here.

    # fc1 -> ReLU -> fc2 (padded columns are exact zeros, sliced off at store)
    a1 = jnp.maximum(bdot(hn, w1) + b1, 0.0)               # (BTILE, 32)
    logits = bdot(a1, w2) + b2                             # (BTILE, 32)
    out_ref[...] = logits[:, :CLASSES].astype(out_ref.dtype)


def sentiment_forward(tokens, params):
    B, T = tokens.shape
    assert T == SEQ
    n_tiles = (B + BTILE - 1) // BTILE
    Bp = n_tiles * BTILE

    # Pad batch to a multiple of 8 and flatten each tile time-major so every
    # per-timestep tile fills all 8 sublanes of a vreg.
    tok_p = jnp.zeros((Bp, T), jnp.int32).at[:B, :].set(tokens)
    tok_tm = (tok_p.reshape(n_tiles, BTILE, T)
              .transpose(0, 2, 1)
              .reshape(n_tiles * T * BTILE, 1))

    out = pl.pallas_call(
        sentiment_kernel,
        out_shape=jax.ShapeDtypeStruct((Bp, CLASSES), jnp.float32),
        grid=(n_tiles,),
        in_specs=[
            pl.BlockSpec((T * BTILE, 1), lambda i: (i, 0)),          # tokens
            pl.BlockSpec((W_SLAB_ROWS, HID), lambda i: (0, 0)),      # bf16 weights (resident)
            pl.BlockSpec((8, HID), lambda i: (0, 0)),                # f32 vectors (resident)
        ],
        out_specs=pl.BlockSpec((BTILE, CLASSES), lambda i: (i, 0)),
        compiler_params=pltpu.CompilerParams(
            dimension_semantics=("parallel",)),
    )(tok_tm, params["w_slab"], params["v_slab"])
    return out[:B]


# --- deterministic parameter init (PyTorch shapes) ---------------------------
def init_params(key):
    ks = jax.random.split(key, 12)
    s = 0.1
    return dict(
        embedding=jax.random.normal(ks[0], (VOCAB, EMB), jnp.float32) * s,
        w_ih0=jax.random.normal(ks[1], (HID, EMB), jnp.float32) * s,   # nn.RNN weight_ih_l0
        w_ih1=jax.random.normal(ks[2], (HID, HID), jnp.float32) * s,   # weight_ih_l1
        w_hh0=jax.random.normal(ks[3], (HID, HID), jnp.float32) * s,   # weight_hh_l0
        w_hh1=jax.random.normal(ks[4], (HID, HID), jnp.float32) * s,   # weight_hh_l1
        b_ih=jax.random.normal(ks[5], (LAYERS, HID), jnp.float32) * s,
        b_hh=jax.random.normal(ks[6], (LAYERS, HID), jnp.float32) * s,
        ln_g=jnp.ones((HID,), jnp.float32),
        ln_b=jnp.zeros((HID,), jnp.float32),
        w1=jax.random.normal(ks[7], (16, HID), jnp.float32) * s,       # nn.Linear(H, 16)
        b1=jax.random.normal(ks[8], (16,), jnp.float32) * s,
        w2=jax.random.normal(ks[9], (CLASSES, 16), jnp.float32) * s,   # nn.Linear(16, C)
        b2=jax.random.normal(ks[10], (CLASSES,), jnp.float32) * s,
    )


def prepare_params(p):
    """Fold / transpose / cast and pack into the two kernel slabs."""
    # Fold layer-0 input projection and both layer-0 biases into the table.
    fused = p["embedding"] @ p["w_ih0"].T + p["b_ih"][0] + p["b_hh"][0]   # (VOCAB, H)
    fused = (jnp.zeros((VOCAB_PAD, HID), jnp.float32).at[:VOCAB].set(fused)
             ).astype(jnp.bfloat16)

    w_hh0 = p["w_hh0"].T.astype(jnp.bfloat16)      # (H, H) for h @ W
    w_ih1 = p["w_ih1"].T.astype(jnp.bfloat16)
    w_hh1 = p["w_hh1"].T.astype(jnp.bfloat16)
    w1 = p["w1"].T.astype(jnp.bfloat16)            # (H, 16)
    w2 = p["w2"].T.astype(jnp.bfloat16)            # (16, C)

    b_l1 = (p["b_ih"][1] + p["b_hh"][1]).reshape(1, HID)
    ln_g = p["ln_g"].reshape(1, HID)
    ln_b = p["ln_b"].reshape(1, HID)
    b1 = p["b1"].reshape(1, 16)
    b2 = p["b2"].reshape(1, CLASSES)

    # bf16 weight slab (224, 32)
    w1_pad = jnp.zeros((HID, HID), jnp.bfloat16).at[:, :16].set(w1)
    w2_pad = jnp.zeros((HID, HID), jnp.bfloat16).at[:16, :CLASSES].set(w2)
    w_slab = jnp.concatenate([fused, w_hh0, w_ih1, w_hh1, w1_pad, w2_pad], axis=0)

    # f32 small-vector slab (8, 32)
    v = jnp.zeros((8, HID), jnp.float32)
    v = v.at[0].set(b_l1[0])
    v = v.at[1].set(ln_g[0])
    v = v.at[2].set(ln_b[0])
    v = v.at[3, :16].set(b1[0])
    v = v.at[4, :CLASSES].set(b2[0])

    return dict(w_slab=w_slab, v_slab=v,
                fused_table=fused, w_hh0=w_hh0, w_ih1=w_ih1, w_hh1=w_hh1,
                b_l1=b_l1, ln_g=ln_g, ln_b=ln_b, w1=w1, b1=b1, w2=w2, b2=b2)


# --- pure-JAX reference (mirrors the kernel's bf16 matmul-input casts) -------
def reference_forward(tokens, p):
    def bdot(a, w):
        return jnp.dot(a.astype(jnp.bfloat16), w,
                       preferred_element_type=jnp.float32)

    pre0 = jnp.take(p["fused_table"], tokens, axis=0).astype(jnp.float32)  # (B, T, H)
    B = tokens.shape[0]
    h0 = jnp.zeros((B, HID), jnp.float32)
    h1 = jnp.zeros((B, HID), jnp.float32)
    for t in range(SEQ):
        h0 = jnp.tanh(pre0[:, t, :] + bdot(h0, p["w_hh0"]))
        h1 = jnp.tanh(p["b_l1"] + bdot(h0, p["w_ih1"]) + bdot(h1, p["w_hh1"]))
    x = h1
    mean = x.mean(-1, keepdims=True)
    var = ((x - mean) ** 2).mean(-1, keepdims=True)
    x = (x - mean) * lax.rsqrt(var + LN_EPS)
    x = x * p["ln_g"] + p["ln_b"]
    x = jnp.maximum(bdot(x, p["w1"]) + p["b1"], 0.0)
    return bdot(x, p["w2"]) + p["b2"]


if __name__ == "__main__":
    key = jax.random.PRNGKey(0)
    k_tok, k_par = jax.random.split(key)
    tokens = jax.random.randint(k_tok, (BATCH, SEQ), 0, VOCAB, dtype=jnp.int32)
    params = prepare_params(init_params(k_par))

    out = sentiment_forward(tokens, params)
    out = jax.block_until_ready(out)

    ref = reference_forward(tokens, params)
    assert out.shape == (BATCH, CLASSES)
    assert jnp.allclose(out, ref, atol=1e-4, rtol=1e-4), "mismatch vs reference"

    print("KERNEL_OK")
</pallas_src>

<mosaic_0001>
module attributes {stable_mosaic.version = 11 : i64} {
  func.func @sentiment_kernel(%arg0: i32, %arg1: memref<64x1xi32, #tpu.memory_space<vmem>>, %arg2: memref<224x32xbf16, #tpu.memory_space<vmem>>, %arg3: memref<8x32xf32, #tpu.memory_space<vmem>>, %arg4: memref<8x3xf32, #tpu.memory_space<vmem>>) attributes {dimension_semantics = [#tpu.dimension_semantics<parallel>], iteration_bounds = array<i64: 1>, scalar_prefetch = 0 : i64, scratch_operands = 0 : i64, tpu.core_type = #tpu.core_type<tc>, window_params = [{transform_indices = @transform_0, window_bounds = array<i64: 64, 1>}, {pipeline_mode = #tpu.pipeline_mode<synchronous>, transform_indices = @transform_1, window_bounds = array<i64: 224, 32>}, {pipeline_mode = #tpu.pipeline_mode<synchronous>, transform_indices = @transform_2, window_bounds = array<i64: 8, 32>}, {transform_indices = @transform_3, window_bounds = array<i64: 8, 3>}]} {
    %c0 = arith.constant 0 : index
    %c0_0 = arith.constant 0 : index
    %0 = vector.load %arg1[%c0, %c0_0] : memref<64x1xi32, #tpu.memory_space<vmem>>, vector<64x1xi32>
    %1 = tpu.iota {dimensions = array<i32: 1>} : vector<64x64xi32>
    %2 = vector.broadcast %0 : vector<64x1xi32> to vector<64x64xi32>
    %3 = arith.cmpi eq, %2, %1 : vector<64x64xi32>
    %4 = arith.extui %3 : vector<64x64xi1> to vector<64x64xi32>
    %5 = arith.sitofp %4 : vector<64x64xi32> to vector<64x64xf32>
    %6 = arith.truncf %5 : vector<64x64xf32> to vector<64x64xbf16>
    %c0_1 = arith.constant 0 : index
    %c0_2 = arith.constant 0 : index
    %7 = vector.load %arg2[%c0_1, %c0_2] : memref<224x32xbf16, #tpu.memory_space<vmem>>, vector<64x32xbf16>
    %cst = arith.constant dense<0.000000e+00> : vector<64x32xf32>
    %8 = tpu.matmul %6, %7, %cst {dimension_numbers = #tpu.dot_dimension_numbers<[1], [0], [0], [1], [0, 0, 1, 1], [], []>} : vector<64x64xbf16>, vector<64x32xbf16>, vector<64x32xf32> -> vector<64x32xf32>
    %c64 = arith.constant 64 : index
    %c0_3 = arith.constant 0 : index
    %9 = vector.load %arg2[%c64, %c0_3] : memref<224x32xbf16, #tpu.memory_space<vmem>>, vector<32x32xbf16>
    %c96 = arith.constant 96 : index
    %c0_4 = arith.constant 0 : index
    %10 = vector.load %arg2[%c96, %c0_4] : memref<224x32xbf16, #tpu.memory_space<vmem>>, vector<32x32xbf16>
    %c128 = arith.constant 128 : index
    %c0_5 = arith.constant 0 : index
    %11 = vector.load %arg2[%c128, %c0_5] : memref<224x32xbf16, #tpu.memory_space<vmem>>, vector<32x32xbf16>
    %c160 = arith.constant 160 : index
    %c0_6 = arith.constant 0 : index
    %12 = vector.load %arg2[%c160, %c0_6] : memref<224x32xbf16, #tpu.memory_space<vmem>>, vector<32x32xbf16>
    %c192 = arith.constant 192 : index
    %c0_7 = arith.constant 0 : index
    %13 = vector.load %arg2[%c192, %c0_7] : memref<224x32xbf16, #tpu.memory_space<vmem>>, vector<32x32xbf16>
    %c0_8 = arith.constant 0 : index
    %c0_9 = arith.constant 0 : index
    %14 = vector.load %arg3[%c0_8, %c0_9] : memref<8x32xf32, #tpu.memory_space<vmem>>, vector<8x32xf32>
    %15 = vector.extract_strided_slice %14 {offsets = [0, 0], sizes = [1, 32], strides = [1, 1]} : vector<8x32xf32> to vector<1x32xf32>
    %16 = vector.extract_strided_slice %14 {offsets = [1, 0], sizes = [1, 32], strides = [1, 1]} : vector<8x32xf32> to vector<1x32xf32>
    %17 = vector.extract_strided_slice %14 {offsets = [2, 0], sizes = [1, 32], strides = [1, 1]} : vector<8x32xf32> to vector<1x32xf32>
    %18 = vector.extract_strided_slice %14 {offsets = [3, 0], sizes = [1, 32], strides = [1, 1]} : vector<8x32xf32> to vector<1x32xf32>
    %19 = vector.extract_strided_slice %14 {offsets = [4, 0], sizes = [1, 32], strides = [1, 1]} : vector<8x32xf32> to vector<1x32xf32>
    %20 = vector.extract_strided_slice %8 {offsets = [0, 0], sizes = [8, 32], strides = [1, 1]} : vector<64x32xf32> to vector<8x32xf32>
    %21 = math.tanh %20 : vector<8x32xf32>
    %22 = vector.extract_strided_slice %8 {offsets = [8, 0], sizes = [8, 32], strides = [1, 1]} : vector<64x32xf32> to vector<8x32xf32>
    %23 = arith.truncf %21 : vector<8x32xf32> to vector<8x32xbf16>
    %cst_10 = arith.constant dense<0.000000e+00> : vector<8x32xf32>
    %24 = tpu.matmul %23, %9, %cst_10 {dimension_numbers = #tpu.dot_dimension_numbers<[1], [0], [0], [1], [0, 0, 1, 1], [], []>} : vector<8x32xbf16>, vector<32x32xbf16>, vector<8x32xf32> -> vector<8x32xf32>
    %25 = arith.addf %22, %24 : vector<8x32xf32>
    %26 = math.tanh %25 : vector<8x32xf32>
    %27 = arith.truncf %21 : vector<8x32xf32> to vector<8x32xbf16>
    %cst_11 = arith.constant dense<0.000000e+00> : vector<8x32xf32>
    %28 = tpu.matmul %27, %10, %cst_11 {dimension_numbers = #tpu.dot_dimension_numbers<[1], [0], [0], [1], [0, 0, 1, 1], [], []>} : vector<8x32xbf16>, vector<32x32xbf16>, vector<8x32xf32> -> vector<8x32xf32>
    %29 = vector.broadcast %15 : vector<1x32xf32> to vector<8x32xf32>
    %30 = arith.addf %29, %28 : vector<8x32xf32>
    %31 = math.tanh %30 : vector<8x32xf32>
    %32 = vector.extract_strided_slice %8 {offsets = [16, 0], sizes = [8, 32], strides = [1, 1]} : vector<64x32xf32> to vector<8x32xf32>
    %33 = arith.truncf %26 : vector<8x32xf32> to vector<8x32xbf16>
    %cst_12 = arith.constant dense<0.000000e+00> : vector<8x32xf32>
    %34 = tpu.matmul %33, %9, %cst_12 {dimension_numbers = #tpu.dot_dimension_numbers<[1], [0], [0], [1], [0, 0, 1, 1], [], []>} : vector<8x32xbf16>, vector<32x32xbf16>, vector<8x32xf32> -> vector<8x32xf32>
    %35 = arith.addf %32, %34 : vector<8x32xf32>
    %36 = math.tanh %35 : vector<8x32xf32>
    %37 = arith.truncf %26 : vector<8x32xf32> to vector<8x32xbf16>
    %cst_13 = arith.constant dense<0.000000e+00> : vector<8x32xf32>
    %38 = tpu.matmul %37, %10, %cst_13 {dimension_numbers = #tpu.dot_dimension_numbers<[1], [0], [0], [1], [0, 0, 1, 1], [], []>} : vector<8x32xbf16>, vector<32x32xbf16>, vector<8x32xf32> -> vector<8x32xf32>
    %39 = vector.broadcast %15 : vector<1x32xf32> to vector<8x32xf32>
    %40 = arith.addf %39, %38 : vector<8x32xf32>
    %41 = arith.truncf %31 : vector<8x32xf32> to vector<8x32xbf16>
    %cst_14 = arith.constant dense<0.000000e+00> : vector<8x32xf32>
    %42 = tpu.matmul %41, %11, %cst_14 {dimension_numbers = #tpu.dot_dimension_numbers<[1], [0], [0], [1], [0, 0, 1, 1], [], []>} : vector<8x32xbf16>, vector<32x32xbf16>, vector<8x32xf32> -> vector<8x32xf32>
    %43 = arith.addf %40, %42 : vector<8x32xf32>
    %44 = math.tanh %43 : vector<8x32xf32>
    %45 = vector.extract_strided_slice %8 {offsets = [24, 0], sizes = [8, 32], strides = [1, 1]} : vector<64x32xf32> to vector<8x32xf32>
    %46 = arith.truncf %36 : vector<8x32xf32> to vector<8x32xbf16>
    %cst_15 = arith.constant dense<0.000000e+00> : vector<8x32xf32>
    %47 = tpu.matmul %46, %9, %cst_15 {dimension_numbers = #tpu.dot_dimension_numbers<[1], [0], [0], [1], [0, 0, 1, 1], [], []>} : vector<8x32xbf16>, vector<32x32xbf16>, vector<8x32xf32> -> vector<8x32xf32>
    %48 = arith.addf %45, %47 : vector<8x32xf32>
    %49 = math.tanh %48 : vector<8x32xf32>
    %50 = arith.truncf %36 : vector<8x32xf32> to vector<8x32xbf16>
    %cst_16 = arith.constant dense<0.000000e+00> : vector<8x32xf32>
    %51 = tpu.matmul %50, %10, %cst_16 {dimension_numbers = #tpu.dot_dimension_numbers<[1], [0], [0], [1], [0, 0, 1, 1], [], []>} : vector<8x32xbf16>, vector<32x32xbf16>, vector<8x32xf32> -> vector<8x32xf32>
    %52 = vector.broadcast %15 : vector<1x32xf32> to vector<8x32xf32>
    %53 = arith.addf %52, %51 : vector<8x32xf32>
    %54 = arith.truncf %44 : vector<8x32xf32> to vector<8x32xbf16>
    %cst_17 = arith.constant dense<0.000000e+00> : vector<8x32xf32>
    %55 = tpu.matmul %54, %11, %cst_17 {dimension_numbers = #tpu.dot_dimension_numbers<[1], [0], [0], [1], [0, 0, 1, 1], [], []>} : vector<8x32xbf16>, vector<32x32xbf16>, vector<8x32xf32> -> vector<8x32xf32>
    %56 = arith.addf %53, %55 : vector<8x32xf32>
    %57 = math.tanh %56 : vector<8x32xf32>
    %58 = vector.extract_strided_slice %8 {offsets = [32, 0], sizes = [8, 32], strides = [1, 1]} : vector<64x32xf32> to vector<8x32xf32>
    %59 = arith.truncf %49 : vector<8x32xf32> to vector<8x32xbf16>
    %cst_18 = arith.constant dense<0.000000e+00> : vector<8x32xf32>
    %60 = tpu.matmul %59, %9, %cst_18 {dimension_numbers = #tpu.dot_dimension_numbers<[1], [0], [0], [1], [0, 0, 1, 1], [], []>} : vector<8x32xbf16>, vector<32x32xbf16>, vector<8x32xf32> -> vector<8x32xf32>
    %61 = arith.addf %58, %60 : vector<8x32xf32>
    %62 = math.tanh %61 : vector<8x32xf32>
    %63 = arith.truncf %49 : vector<8x32xf32> to vector<8x32xbf16>
    %cst_19 = arith.constant dense<0.000000e+00> : vector<8x32xf32>
    %64 = tpu.matmul %63, %10, %cst_19 {dimension_numbers = #tpu.dot_dimension_numbers<[1], [0], [0], [1], [0, 0, 1, 1], [], []>} : vector<8x32xbf16>, vector<32x32xbf16>, vector<8x32xf32> -> vector<8x32xf32>
    %65 = vector.broadcast %15 : vector<1x32xf32> to vector<8x32xf32>
    %66 = arith.addf %65, %64 : vector<8x32xf32>
    %67 = arith.truncf %57 : vector<8x32xf32> to vector<8x32xbf16>
    %cst_20 = arith.constant dense<0.000000e+00> : vector<8x32xf32>
    %68 = tpu.matmul %67, %11, %cst_20 {dimension_numbers = #tpu.dot_dimension_numbers<[1], [0], [0], [1], [0, 0, 1, 1], [], []>} : vector<8x32xbf16>, vector<32x32xbf16>, vector<8x32xf32> -> vector<8x32xf32>
    %69 = arith.addf %66, %68 : vector<8x32xf32>
    %70 = math.tanh %69 : vector<8x32xf32>
    %71 = vector.extract_strided_slice %8 {offsets = [40, 0], sizes = [8, 32], strides = [1, 1]} : vector<64x32xf32> to vector<8x32xf32>
    %72 = arith.truncf %62 : vector<8x32xf32> to vector<8x32xbf16>
    %cst_21 = arith.constant dense<0.000000e+00> : vector<8x32xf32>
    %73 = tpu.matmul %72, %9, %cst_21 {dimension_numbers = #tpu.dot_dimension_numbers<[1], [0], [0], [1], [0, 0, 1, 1], [], []>} : vector<8x32xbf16>, vector<32x32xbf16>, vector<8x32xf32> -> vector<8x32xf32>
    %74 = arith.addf %71, %73 : vector<8x32xf32>
    %75 = math.tanh %74 : vector<8x32xf32>
    %76 = arith.truncf %62 : vector<8x32xf32> to vector<8x32xbf16>
    %cst_22 = arith.constant dense<0.000000e+00> : vector<8x32xf32>
    %77 = tpu.matmul %76, %10, %cst_22 {dimension_numbers = #tpu.dot_dimension_numbers<[1], [0], [0], [1], [0, 0, 1, 1], [], []>} : vector<8x32xbf16>, vector<32x32xbf16>, vector<8x32xf32> -> vector<8x32xf32>
    %78 = vector.broadcast %15 : vector<1x32xf32> to vector<8x32xf32>
    %79 = arith.addf %78, %77 : vector<8x32xf32>
    %80 = arith.truncf %70 : vector<8x32xf32> to vector<8x32xbf16>
    %cst_23 = arith.constant dense<0.000000e+00> : vector<8x32xf32>
    %81 = tpu.matmul %80, %11, %cst_23 {dimension_numbers = #tpu.dot_dimension_numbers<[1], [0], [0], [1], [0, 0, 1, 1], [], []>} : vector<8x32xbf16>, vector<32x32xbf16>, vector<8x32xf32> -> vector<8x32xf32>
    %82 = arith.addf %79, %81 : vector<8x32xf32>
    %83 = math.tanh %82 : vector<8x32xf32>
    %84 = vector.extract_strided_slice %8 {offsets = [48, 0], sizes = [8, 32], strides = [1, 1]} : vector<64x32xf32> to vector<8x32xf32>
    %85 = arith.truncf %75 : vector<8x32xf32> to vector<8x32xbf16>
    %cst_24 = arith.constant dense<0.000000e+00> : vector<8x32xf32>
    %86 = tpu.matmul %85, %9, %cst_24 {dimension_numbers = #tpu.dot_dimension_numbers<[1], [0], [0], [1], [0, 0, 1, 1], [], []>} : vector<8x32xbf16>, vector<32x32xbf16>, vector<8x32xf32> -> vector<8x32xf32>
    %87 = arith.addf %84, %86 : vector<8x32xf32>
    %88 = math.tanh %87 : vector<8x32xf32>
    %89 = arith.truncf %75 : vector<8x32xf32> to vector<8x32xbf16>
    %cst_25 = arith.constant dense<0.000000e+00> : vector<8x32xf32>
    %90 = tpu.matmul %89, %10, %cst_25 {dimension_numbers = #tpu.dot_dimension_numbers<[1], [0], [0], [1], [0, 0, 1, 1], [], []>} : vector<8x32xbf16>, vector<32x32xbf16>, vector<8x32xf32> -> vector<8x32xf32>
    %91 = vector.broadcast %15 : vector<1x32xf32> to vector<8x32xf32>
    %92 = arith.addf %91, %90 : vector<8x32xf32>
    %93 = arith.truncf %83 : vector<8x32xf32> to vector<8x32xbf16>
    %cst_26 = arith.constant dense<0.000000e+00> : vector<8x32xf32>
    %94 = tpu.matmul %93, %11, %cst_26 {dimension_numbers = #tpu.dot_dimension_numbers<[1], [0], [0], [1], [0, 0, 1, 1], [], []>} : vector<8x32xbf16>, vector<32x32xbf16>, vector<8x32xf32> -> vector<8x32xf32>
    %95 = arith.addf %92, %94 : vector<8x32xf32>
    %96 = math.tanh %95 : vector<8x32xf32>
    %97 = vector.extract_strided_slice %8 {offsets = [56, 0], sizes = [8, 32], strides = [1, 1]} : vector<64x32xf32> to vector<8x32xf32>
    %98 = arith.truncf %88 : vector<8x32xf32> to vector<8x32xbf16>
    %cst_27 = arith.constant dense<0.000000e+00> : vector<8x32xf32>
    %99 = tpu.matmul %98, %9, %cst_27 {dimension_numbers = #tpu.dot_dimension_numbers<[1], [0], [0], [1], [0, 0, 1, 1], [], []>} : vector<8x32xbf16>, vector<32x32xbf16>, vector<8x32xf32> -> vector<8x32xf32>
    %100 = arith.addf %97, %99 : vector<8x32xf32>
    %101 = math.tanh %100 : vector<8x32xf32>
    %102 = arith.truncf %88 : vector<8x32xf32> to vector<8x32xbf16>
    %cst_28 = arith.constant dense<0.000000e+00> : vector<8x32xf32>
    %103 = tpu.matmul %102, %10, %cst_28 {dimension_numbers = #tpu.dot_dimension_numbers<[1], [0], [0], [1], [0, 0, 1, 1], [], []>} : vector<8x32xbf16>, vector<32x32xbf16>, vector<8x32xf32> -> vector<8x32xf32>
    %104 = vector.broadcast %15 : vector<1x32xf32> to vector<8x32xf32>
    %105 = arith.addf %104, %103 : vector<8x32xf32>
    %106 = arith.truncf %96 : vector<8x32xf32> to vector<8x32xbf16>
    %cst_29 = arith.constant dense<0.000000e+00> : vector<8x32xf32>
    %107 = tpu.matmul %106, %11, %cst_29 {dimension_numbers = #tpu.dot_dimension_numbers<[1], [0], [0], [1], [0, 0, 1, 1], [], []>} : vector<8x32xbf16>, vector<32x32xbf16>, vector<8x32xf32> -> vector<8x32xf32>
    %108 = arith.addf %105, %107 : vector<8x32xf32>
    %109 = math.tanh %108 : vector<8x32xf32>
    %110 = arith.truncf %101 : vector<8x32xf32> to vector<8x32xbf16>
    %cst_30 = arith.constant dense<0.000000e+00> : vector<8x32xf32>
    %111 = tpu.matmul %110, %10, %cst_30 {dimension_numbers = #tpu.dot_dimension_numbers<[1], [0], [0], [1], [0, 0, 1, 1], [], []>} : vector<8x32xbf16>, vector<32x32xbf16>, vector<8x32xf32> -> vector<8x32xf32>
    %112 = vector.broadcast %15 : vector<1x32xf32> to vector<8x32xf32>
    %113 = arith.addf %112, %111 : vector<8x32xf32>
    %114 = arith.truncf %109 : vector<8x32xf32> to vector<8x32xbf16>
    %cst_31 = arith.constant dense<0.000000e+00> : vector<8x32xf32>
    %115 = tpu.matmul %114, %11, %cst_31 {dimension_numbers = #tpu.dot_dimension_numbers<[1], [0], [0], [1], [0, 0, 1, 1], [], []>} : vector<8x32xbf16>, vector<32x32xbf16>, vector<8x32xf32> -> vector<8x32xf32>
    %116 = arith.addf %113, %115 : vector<8x32xf32>
    %117 = math.tanh %116 : vector<8x32xf32>
    %cst_32 = arith.constant dense<0.000000e+00> : vector<8xf32>
    %118 = vector.multi_reduction <add>, %117, %cst_32 [1] : vector<8x32xf32> to vector<8xf32>
    %119 = vector.shape_cast %118 : vector<8xf32> to vector<8x1xf32>
    %cst_33 = arith.constant 3.200000e+01 : f32
    %120 = vector.broadcast %cst_33 : f32 to vector<8x1xf32>
    %121 = arith.divf %119, %120 : vector<8x1xf32>
    %122 = vector.broadcast %121 : vector<8x1xf32> to vector<8x32xf32>
    %123 = arith.subf %117, %122 : vector<8x32xf32>
    %124 = arith.mulf %123, %123 : vector<8x32xf32>
    %cst_34 = arith.constant dense<0.000000e+00> : vector<8xf32>
    %125 = vector.multi_reduction <add>, %124, %cst_34 [1] : vector<8x32xf32> to vector<8xf32>
    %126 = vector.shape_cast %125 : vector<8xf32> to vector<8x1xf32>
    %cst_35 = arith.constant 3.200000e+01 : f32
    %127 = vector.broadcast %cst_35 : f32 to vector<8x1xf32>
    %128 = arith.divf %126, %127 : vector<8x1xf32>
    %129 = vector.broadcast %121 : vector<8x1xf32> to vector<8x32xf32>
    %130 = arith.subf %117, %129 : vector<8x32xf32>
    %cst_36 = arith.constant 9.99999974E-6 : f32
    %131 = vector.broadcast %cst_36 : f32 to vector<8x1xf32>
    %132 = arith.addf %128, %131 : vector<8x1xf32>
    %133 = math.rsqrt %132 : vector<8x1xf32>
    %134 = vector.broadcast %133 : vector<8x1xf32> to vector<8x32xf32>
    %135 = arith.mulf %130, %134 : vector<8x32xf32>
    %136 = vector.broadcast %16 : vector<1x32xf32> to vector<8x32xf32>
    %137 = arith.mulf %135, %136 : vector<8x32xf32>
    %138 = vector.broadcast %17 : vector<1x32xf32> to vector<8x32xf32>
    %139 = arith.addf %137, %138 : vector<8x32xf32>
    %140 = arith.truncf %139 : vector<8x32xf32> to vector<8x32xbf16>
    %cst_37 = arith.constant dense<0.000000e+00> : vector<8x32xf32>
    %141 = tpu.matmul %140, %12, %cst_37 {dimension_numbers = #tpu.dot_dimension_numbers<[1], [0], [0], [1], [0, 0, 1, 1], [], []>} : vector<8x32xbf16>, vector<32x32xbf16>, vector<8x32xf32> -> vector<8x32xf32>
    %142 = vector.broadcast %18 : vector<1x32xf32> to vector<8x32xf32>
    %143 = arith.addf %141, %142 : vector<8x32xf32>
    %cst_38 = arith.constant 0.000000e+00 : f32
    %144 = vector.broadcast %cst_38 : f32 to vector<8x32xf32>
    %145 = arith.maximumf %143, %144 : vector<8x32xf32>
    %146 = arith.truncf %145 : vector<8x32xf32> to vector<8x32xbf16>
    %cst_39 = arith.constant dense<0.000000e+00> : vector<8x32xf32>
    %147 = tpu.matmul %146, %13, %cst_39 {dimension_numbers = #tpu.dot_dimension_numbers<[1], [0], [0], [1], [0, 0, 1, 1], [], []>} : vector<8x32xbf16>, vector<32x32xbf16>, vector<8x32xf32> -> vector<8x32xf32>
    %148 = vector.broadcast %19 : vector<1x32xf32> to vector<8x32xf32>
    %149 = arith.addf %147, %148 : vector<8x32xf32>
    %150 = vector.extract_strided_slice %149 {offsets = [0, 0], sizes = [8, 3], strides = [1, 1]} : vector<8x32xf32> to vector<8x3xf32>
    %c0_40 = arith.constant 0 : index
    %c0_41 = arith.constant 0 : index
    %151 = vector.load %arg4[%c0_40, %c0_41] : memref<8x3xf32, #tpu.memory_space<vmem>>, vector<8x3xf32>
    tpu.vector_store %arg4[%c0_40, %c0_41], %150 {strides = array<i32>} : memref<8x3xf32, #tpu.memory_space<vmem>>, vector<8x3xf32>,
    return
  }
  func.func @transform_0(%arg0: i32) -> (i32, i32) {
    %c0_i32 = arith.constant 0 : i32
    %c0_i32_0 = arith.constant 0 : i32
    return %arg0, %c0_i32 : i32, i32
  }
  func.func @transform_1(%arg0: i32) -> (i32, i32) {
    %c0_i32 = arith.constant 0 : i32
    %c0_i32_0 = arith.constant 0 : i32
    %c0_i32_1 = arith.constant 0 : i32
    return %c0_i32, %c0_i32_0 : i32, i32
  }
  func.func @transform_2(%arg0: i32) -> (i32, i32) {
    %c0_i32 = arith.constant 0 : i32
    %c0_i32_0 = arith.constant 0 : i32
    %c0_i32_1 = arith.constant 0 : i32
    return %c0_i32, %c0_i32_0 : i32, i32
  }
  func.func @transform_3(%arg0: i32) -> (i32, i32) {
    %c0_i32 = arith.constant 0 : i32
    %c0_i32_0 = arith.constant 0 : i32
    return %arg0, %c0_i32 : i32, i32
  }
}

</mosaic_0001>

<bundles_post_ra>
// kernel: tpu_custom_call.1
= control target key start
LH: loop header
LB: loop body
LE: loop exit
PB: predicated region body
PF: predicated region fallthrough
CT: control target
= control target key end

     0   :  { %v842_v0 = vmov 0   ;;  %v23_v13 = vlaneseq  ;;  %v843_v18 = vmov 0.0   ;;  %vm109_vm2 = vcmask 523264   ;;  %s1040_s0 = inlined_call_operand.vmem [shape: s32[64,1], index: 0, kind: input, shape index: {}]   ;;  %s1041_s1 = inlined_call_operand.vmem [shape: bf16[224,32], index: 1, kind: input, shape index: {}]   ;;  %s1042_s2 = inlined_call_operand.vmem [shape: f32[8,32], index: 2, kind: input, shape index: {}]   ;;  %s1043_s3 = inlined_call_operand.vmem [shape: f32[8,3], index: 3, kind: output, shape index: {}]  }
   0x1   :  { %804 = vset.pattern.permute.xlu1 %v842_v0  ;;  %803 = vset.pattern.permute.xlu0 %v842_v0  ;;  %v17_v1 = vld [vmem:[%s1040_s0 + $0x10] sm:$0xff]  ;;  %v15_v2 = vld [vmem:[%s1040_s0] sm:$0xff]  ;;  %v789_v4 = vld [vmem:[%s1041_s1 + $0x18] sm:$0xff]  ;;  %vm186_vm9 = vcmask 261120   ;;  %vm688_vm14 = vcmask 23552  }
   0x2   :  { %32 = vperm.xlu1 %804, %v17_v1   ;;  %26 = vperm.xlu0 %803, %v15_v2   ;;  %v19_v3 = vld [vmem:[%s1040_s0 + $0x20] sm:$0xff]  ;;  %v18_v5 = vld [vmem:[%s1040_s0 + $0x18] sm:$0xff]  ;;  %v16_v6 = vld [vmem:[%s1040_s0 + $0x8] sm:$0xff]  ;;  %v24_v15 = vand.u32 127, %v23_v13 }
   0x3   :  { %805 = vset.pattern.permute.xlu2 %v842_v0  ;;  %126 = vmatpush.bf16.msra.mxu0 %v789_v4  ;;  %v20_v7 = vld [vmem:[%s1040_s0 + $0x28] sm:$0xff]  ;;  %v22_v8 = vld [vmem:[%s1040_s0 + $0x38] sm:$0xff]  ;;  %v21_v9 = vld [vmem:[%s1040_s0 + $0x30] sm:$0xff] }
   0x4   :  { %38 = vperm.xlu2 %805, %v19_v3   ;;  %v788_v10 = vld [vmem:[%s1041_s1 + $0x10] sm:$0xff]  ;;  %v787_v11 = vld [vmem:[%s1041_s1 + $0x8] sm:$0xff]  ;;  %v786_v12 = vld [vmem:[%s1041_s1] sm:$0xff] }
   0x5   :  { %v908_v36 = vld [vmem:[%s1041_s1 + $0x28] sm:$0xff]  ;;  %v913_v37 = vld [vmem:[%s1041_s1 + $0x38] sm:$0xff]  ;;  %v922_v38 = vld [vmem:[%s1041_s1 + $0x20] sm:$0xff] }
   0x6   :  { %196 = vmatpush.bf16.msra.mxu1 %v908_v36  ;;  %223 = vmatpush.bf16.msra.mxu2 %v913_v37  ;;  %v927_v39 = vld [vmem:[%s1041_s1 + $0x30] sm:$0xff]  ;;  %v944_v43 = vld [vmem:[%s1041_s1 + $0x48] sm:$0xff]  ;;  %v951_v44 = vld [vmem:[%s1041_s1 + $0x40] sm:$0xff] }
   0x7   :  { %127 = vmatpush.bf16.msra.mxu0 %v788_v10  ;;  %243 = vmatpush.bf16.msra.mxu3 %v908_v36  ;;  %v960_v47 = vld [vmem:[%s1042_s2] sm:$0xff] }
   0x8   :  { %v963_v49 = vperm.slane %v960_v47, 0 }
   0xa   :  { %35 = vperm.xlu1 %804, %v18_v5   ;;  %29 = vperm.xlu0 %803, %v16_v6  }
   0xb   :  { %128 = vmatpush.bf16.msra.mxu0 %v787_v11  ;;  %197 = vmatpush.bf16.msra.mxu1 %v922_v38 }
   0xc   :  { %41 = vperm.xlu2 %805, %v20_v7   ;;  %224 = vmatpush.bf16.msra.mxu2 %v927_v39 }
   0xd   :  { %244 = vmatpush.bf16.msra.mxu3 %v922_v38 }
   0xf   :  { %129 = vmatpush.bf16.msra.mxu0 %v786_v12  ;;  %258 = vmatpush.bf16.msrb.mxu1 %v913_v37 }
  0x10   :  { %288 = vmatpush.bf16.msrb.mxu2 %v944_v43 }
  0x11   :  { %307 = vmatpush.bf16.msrb.mxu3 %v908_v36 }
  0x12   :  { %47 = vperm.xlu1 %804, %v22_v8   ;;  %44 = vperm.xlu0 %803, %v21_v9  }
  0x13   :  { %478 = vmatpush.bf16.msrb.mxu0 %v913_v37  ;;  %259 = vmatpush.bf16.msrb.mxu1 %v927_v39 }
  0x14   :  { %289 = vmatpush.bf16.msrb.mxu2 %v951_v44 }
  0x15   :  { %308 = vmatpush.bf16.msrb.mxu3 %v922_v38 }
  0x17   :  { %479 = vmatpush.bf16.msrb.mxu0 %v927_v39 }
  0x5e   :  { %v39_v25 = vpop.permute.xlu2 %38 }
  0x5f   :  { %vm53_vm5 = vcmp.eq.s32.totalorder %v39_v25, %v24_v15 }
  0x60   :  { %v698_v28 = vsel %vm53_vm5, 1.0, %v843_v18 }
  0x66   :  { %v42_v27 = vpop.permute.xlu2 %41 }
  0x67   :  { %vm54_vm6 = vcmp.eq.s32.totalorder %v42_v27, %v24_v15 }
  0x68   :  { %v699_v29 = vsel %vm54_vm6, 1.0, %v843_v18 }
  0x69   :  { %v75_v30 = vpack.c.bf16 %v699_v29, %v698_v28 }
  0x74   :  { %v27_v14 = vpop.permute.xlu0 %26  ;;  %v33_v16 = vpop.permute.xlu1 %32 }
  0x75   :  { %vm49_vm0 = vcmp.eq.s32.totalorder %v27_v14, %v24_v15  ;;  %vm51_vm3 = vcmp.eq.s32.totalorder %v33_v16, %v24_v15 }
  0x76   :  { %v694_v19 = vsel %vm49_vm0, 1.0, %v843_v18  ;;  %v696_v23 = vsel %vm51_vm3, 1.0, %v843_v18 }
  0x7c   :  { %v30_v17 = vpop.permute.xlu0 %29  ;;  %v36_v22 = vpop.permute.xlu1 %35 }
  0x7d   :  { %vm50_vm1 = vcmp.eq.s32.totalorder %v30_v17, %v24_v15  ;;  %vm52_vm4 = vcmp.eq.s32.totalorder %v36_v22, %v24_v15 }
  0x7e   :  { %v695_v20 = vsel %vm50_vm1, 1.0, %v843_v18  ;;  %v697_v24 = vsel %vm52_vm4, 1.0, %v843_v18 }
  0x7f   :  { %v73_v21 = vpack.c.bf16 %v695_v20, %v694_v19  ;;  %v74_v26 = vpack.c.bf16 %v697_v24, %v696_v23 }
  0x81   :  { %718 = vmatmul.msk.bf16.vlgmr.msra.gmra.mxu0 %vm109_vm2, %v73_v21 }
  0x82   :  { %548 = vmatpush.bf16.msra.mxu0 %v944_v43 }
  0x84   :  { %v48_v31 = vpop.permute.xlu1 %47  ;;  %v45_v32 = vpop.permute.xlu0 %44 }
  0x85   :  { %vm56_vm7 = vcmp.eq.s32.totalorder %v48_v31, %v24_v15  ;;  %vm55_vm8 = vcmp.eq.s32.totalorder %v45_v32, %v24_v15 }
  0x86   :  { %v701_v33 = vsel %vm56_vm7, 1.0, %v843_v18  ;;  %v700_v34 = vsel %vm55_vm8, 1.0, %v843_v18  ;;  %549 = vmatpush.bf16.msra.mxu0 %v951_v44 }
  0x87   :  { %v76_v35 = vpack.c.bf16 %v701_v33, %v700_v34 }
  0x91   :  { %719 = vmatmul.msk.bf16.gmra.mxu0 %vm109_vm2, %v74_v26 }
  0xa1   :  { %720 = vmatmul.msk.bf16.gmra.mxu0 %vm109_vm2, %v75_v30 }
  0xb1   :  { %721 = vmatmul.msk.bf16.gmra.mxu0 %vm109_vm2, %v76_v35 }
  0xfe   :  { %v131_v40 = vpop.f32.mrf.mxu0 }
  0xff   :  { %806 = vtanh.f32 %v131_v40 }
 0x105   :  { %v807_v41 = vpop.eup %806 }
 0x106   :  { %v173_v42 = vpack.c.bf16 %v807_v41, %v807_v41  ;;  %v133_v45 = vpop.f32.mrf.mxu0 }
 0x108   :  { %730 = vmatmul.msk.bf16.vlgmr.msra.gmra.mxu1 %vm186_vm9, %v173_v42  ;;  %739 = vmatmul.msk.bf16.vlgmr.msra.gmra.mxu2 %vm186_vm9, %v173_v42 }
 0x109   :  { %322 = vmatpush.bf16.msra.mxu1 %v913_v37  ;;  %340 = vmatpush.bf16.msra.mxu2 %v944_v43 }
 0x10d   :  { %323 = vmatpush.bf16.msra.mxu1 %v927_v39  ;;  %341 = vmatpush.bf16.msra.mxu2 %v951_v44 }
 0x10e   :  { %v136_v59 = vpop.f32.mrf.mxu0 }
 0x116   :  { %v138_v9 = vpop.f32.mrf.mxu0 }
 0x11e   :  { %v141_v23 = vpop.f32.mrf.mxu0 }
 0x185   :  { %v199_v46 = vpop.f32.mrf.mxu1 }
 0x186   :  { %v203_v48 = vadd.f32 %v199_v46, %v133_v45 }
 0x188   :  { %808 = vtanh.f32 %v203_v48 }
 0x18b   :  { %v226_v50 = vpop.f32.mrf.mxu2 }
 0x18c   :  { %v231_v51 = vadd.f32 %v963_v49, %v226_v50 }
 0x18d   :  { %v201_v52 = vpop.f32.mrf.mxu1 }
 0x18e   :  { %v809_v53 = vpop.eup %808  ;;  %810 = vtanh.f32 %v231_v51 }
 0x18f   :  { %v233_v54 = vpack.c.bf16 %v809_v53, %v809_v53 }
 0x191   :  { %740 = vmatmul.msk.bf16.vlgmr.msra.gmra.mxu3 %vm186_vm9, %v233_v54  ;;  %741 = vmatmul.msk.bf16.vlgmr.msrb.gmra.mxu1 %vm186_vm9, %v233_v54 }
 0x192   :  { %359 = vmatpush.bf16.msra.mxu3 %v908_v36  ;;  %374 = vmatpush.bf16.msrb.mxu1 %v913_v37 }
 0x193   :  { %v228_v55 = vpop.f32.mrf.mxu2 }
 0x194   :  { %v811_v56 = vpop.eup %810 }
 0x195   :  { %v266_v57 = vpack.c.bf16 %v811_v56, %v811_v56 }
 0x196   :  { %360 = vmatpush.bf16.msra.mxu3 %v922_v38  ;;  %375 = vmatpush.bf16.msrb.mxu1 %v927_v39 }
 0x197   :  { %750 = vmatmul.msk.bf16.vlgmr.msrb.gmra.mxu2 %vm186_vm9, %v266_v57 }
 0x198   :  { %392 = vmatpush.bf16.msrb.mxu2 %v944_v43 }
 0x19c   :  { %393 = vmatpush.bf16.msrb.mxu2 %v951_v44 }
 0x20e   :  { %v261_v58 = vpop.f32.mrf.mxu1 }
 0x20f   :  { %v265_v63 = vadd.f32 %v261_v58, %v963_v49 }
 0x214   :  { %v246_v60 = vpop.f32.mrf.mxu3 }
 0x215   :  { %v250_v61 = vadd.f32 %v246_v60, %v136_v59 }
 0x216   :  { %v263_v62 = vpop.f32.mrf.mxu1 }
 0x217   :  { %812 = vtanh.f32 %v250_v61 }
 0x21a   :  { %v291_v0 = vpop.f32.mrf.mxu2 }
 0x21b   :  { %v295_v1 = vadd.f32 %v291_v0, %v265_v63 }
 0x21c   :  { %v248_v2 = vpop.f32.mrf.mxu3 }
 0x21d   :  { %v813_v3 = vpop.eup %812  ;;  %814 = vtanh.f32 %v295_v1 }
 0x21e   :  { %v297_v4 = vpack.c.bf16 %v813_v3, %v813_v3 }
 0x220   :  { %751 = vmatmul.msk.bf16.vlgmr.msrb.gmra.mxu3 %vm186_vm9, %v297_v4  ;;  %752 = vmatmul.msk.bf16.vlgmr.msra.gmra.mxu1 %vm186_vm9, %v297_v4 }
 0x221   :  { %411 = vmatpush.bf16.msrb.mxu3 %v908_v36  ;;  %426 = vmatpush.bf16.msra.mxu1 %v913_v37 }
 0x222   :  { %v293_v5 = vpop.f32.mrf.mxu2 }
 0x223   :  { %v815_v6 = vpop.eup %814 }
 0x224   :  { %v330_v7 = vpack.c.bf16 %v815_v6, %v815_v6 }
 0x225   :  { %412 = vmatpush.bf16.msrb.mxu3 %v922_v38  ;;  %427 = vmatpush.bf16.msra.mxu1 %v927_v39 }
 0x226   :  { %753 = vmatmul.msk.bf16.vlgmr.msra.gmra.mxu2 %vm186_vm9, %v330_v7 }
 0x227   :  { %444 = vmatpush.bf16.msra.mxu2 %v944_v43 }
 0x22b   :  { %445 = vmatpush.bf16.msra.mxu2 %v951_v44 }
 0x29d   :  { %v325_v8 = vpop.f32.mrf.mxu1 }
 0x29e   :  { %v329_v13 = vadd.f32 %v325_v8, %v963_v49 }
 0x2a3   :  { %v310_v10 = vpop.f32.mrf.mxu3 }
 0x2a4   :  { %v314_v11 = vadd.f32 %v310_v10, %v138_v9 }
 0x2a5   :  { %v327_v12 = vpop.f32.mrf.mxu1 }
 0x2a6   :  { %816 = vtanh.f32 %v314_v11 }
 0x2a9   :  { %v343_v14 = vpop.f32.mrf.mxu2 }
 0x2aa   :  { %v347_v15 = vadd.f32 %v343_v14, %v329_v13 }
 0x2ab   :  { %v312_v16 = vpop.f32.mrf.mxu3 }
 0x2ac   :  { %v817_v17 = vpop.eup %816  ;;  %818 = vtanh.f32 %v347_v15 }
 0x2ad   :  { %v349_v18 = vpack.c.bf16 %v817_v17, %v817_v17 }
 0x2af   :  { %754 = vmatmul.msk.bf16.vlgmr.msra.gmra.mxu3 %vm186_vm9, %v349_v18  ;;  %755 = vmatmul.msk.bf16.vlgmr.msrb.gmra.mxu1 %vm186_vm9, %v349_v18 }
 0x2b0   :  { %463 = vmatpush.bf16.msra.mxu3 %v908_v36  ;;  %496 = vmatpush.bf16.msrb.mxu1 %v944_v43 }
 0x2b1   :  { %v345_v19 = vpop.f32.mrf.mxu2 }
 0x2b2   :  { %v819_v20 = vpop.eup %818 }
 0x2b3   :  { %v382_v21 = vpack.c.bf16 %v819_v20, %v819_v20 }
 0x2b4   :  { %464 = vmatpush.bf16.msra.mxu3 %v922_v38  ;;  %497 = vmatpush.bf16.msrb.mxu1 %v951_v44 }
 0x2b5   :  { %756 = vmatmul.msk.bf16.vlgmr.msrb.gmra.mxu2 %vm186_vm9, %v382_v21 }
 0x2b6   :  { %515 = vmatpush.bf16.msrb.mxu2 %v908_v36 }
 0x2ba   :  { %516 = vmatpush.bf16.msrb.mxu2 %v922_v38  ;;  %v143_v38 = vpop.f32.mrf.mxu0 }
 0x2c2   :  { %v146_v52 = vpop.f32.mrf.mxu0 }
 0x2ca   :  { %v148_v53 = vpop.f32.mrf.mxu0 }
 0x32c   :  { %v377_v22 = vpop.f32.mrf.mxu1 }
 0x32d   :  { %v381_v27 = vadd.f32 %v377_v22, %v963_v49 }
 0x332   :  { %v362_v24 = vpop.f32.mrf.mxu3 }
 0x333   :  { %v366_v25 = vadd.f32 %v362_v24, %v141_v23  ;;  %v844_v24 = vmov 32.0  }
 0x334   :  { %v379_v26 = vpop.f32.mrf.mxu1 }
 0x335   :  { %820 = vtanh.f32 %v366_v25 }
 0x338   :  { %v395_v28 = vpop.f32.mrf.mxu2 }
 0x339   :  { %v399_v29 = vadd.f32 %v395_v28, %v381_v27 }
 0x33a   :  { %v364_v30 = vpop.f32.mrf.mxu3 }
 0x33b   :  { %v821_v31 = vpop.eup %820  ;;  %822 = vtanh.f32 %v399_v29 }
 0x33c   :  { %v401_v32 = vpack.c.bf16 %v821_v31, %v821_v31 }
 0x33e   :  { %757 = vmatmul.msk.bf16.vlgmr.msrb.gmra.mxu3 %vm186_vm9, %v401_v32  ;;  %758 = vmatmul.msk.bf16.vlgmr.msra.gmra.mxu1 %vm186_vm9, %v401_v32 }
 0x33f   :  { %530 = vmatpush.bf16.msrb.mxu3 %v913_v37  ;;  %567 = vmatpush.bf16.msra.mxu1 %v913_v37 }
 0x340   :  { %v397_v33 = vpop.f32.mrf.mxu2 }
 0x341   :  { %v823_v34 = vpop.eup %822 }
 0x342   :  { %v434_v35 = vpack.c.bf16 %v823_v34, %v823_v34 }
 0x343   :  { %531 = vmatpush.bf16.msrb.mxu3 %v927_v39  ;;  %568 = vmatpush.bf16.msra.mxu1 %v927_v39 }
 0x344   :  { %759 = vmatmul.msk.bf16.vlgmr.msra.gmra.mxu2 %vm186_vm9, %v434_v35  ;;  %v797_v35 = vld [vmem:[%s1041_s1 + $0x58] sm:$0xff] }
 0x345   :  { %585 = vmatpush.bf16.msra.mxu2 %v944_v43 }
 0x349   :  { %586 = vmatpush.bf16.msra.mxu2 %v951_v44 }
 0x3bb   :  { %v429_v36 = vpop.f32.mrf.mxu1 }
 0x3bc   :  { %v433_v37 = vadd.f32 %v429_v36, %v963_v49  ;;  %v796_v36 = vld [vmem:[%s1041_s1 + $0x50] sm:$0xff] }
 0x3c1   :  { %v414_v40 = vpop.f32.mrf.mxu3 }
 0x3c2   :  { %v418_v41 = vadd.f32 %v414_v40, %v143_v38  ;;  %v799_v38 = vld [vmem:[%s1041_s1 + $0x68] sm:$0xff] }
 0x3c3   :  { %v431_v42 = vpop.f32.mrf.mxu1 }
 0x3c4   :  { %824 = vtanh.f32 %v418_v41  ;;  %v798_v42 = vld [vmem:[%s1041_s1 + $0x60] sm:$0xff] }
 0x3c7   :  { %v447_v45 = vpop.f32.mrf.mxu2 }
 0x3c8   :  { %v451_v46 = vadd.f32 %v447_v45, %v433_v37 }
 0x3c9   :  { %v416_v48 = vpop.f32.mrf.mxu3 }
 0x3ca   :  { %v825_v50 = vpop.eup %824  ;;  %826 = vtanh.f32 %v451_v46 }
 0x3cb   :  { %v453_v39 = vpack.c.bf16 %v825_v50, %v825_v50 }
 0x3cd   :  { %760 = vmatmul.msk.bf16.vlgmr.msra.gmra.mxu3 %vm186_vm9, %v453_v39  ;;  %761 = vmatmul.msk.bf16.vlgmr.msrb.gmra.mxu0 %vm186_vm9, %v453_v39 }
 0x3ce   :  { %650 = vmatpush.bf16.msra.mxu3 %v797_v35  ;;  %681 = vmatpush.bf16.msrb.mxu0 %v799_v38 }
 0x3cf   :  { %v449_v43 = vpop.f32.mrf.mxu2 }
 0x3d0   :  { %v827_v44 = vpop.eup %826 }
 0x3d1   :  { %v486_v51 = vpack.c.bf16 %v827_v44, %v827_v44  ;;  %v623_v44 = vperm.slane %v960_v47, 1 }
 0x3d2   :  { %651 = vmatpush.bf16.msra.mxu3 %v796_v36  ;;  %682 = vmatpush.bf16.msrb.mxu0 %v798_v42 }
 0x3d3   :  { %762 = vmatmul.msk.bf16.vlgmr.msrb.gmra.mxu1 %vm186_vm9, %v486_v51 }
 0x44a   :  { %v481_v54 = vpop.f32.mrf.mxu0 }
 0x44b   :  { %v485_v55 = vadd.f32 %v481_v54, %v963_v49 }
 0x450   :  { %v466_v56 = vpop.f32.mrf.mxu3  ;;  %v499_v57 = vpop.f32.mrf.mxu1 }
 0x451   :  { %v470_v58 = vadd.f32 %v466_v56, %v146_v52  ;;  %v503_v59 = vadd.f32 %v499_v57, %v485_v55  ;;  %v628_v57 = vperm.slane %v960_v47, 3 }
 0x452   :  { %v483_v60 = vpop.f32.mrf.mxu0 }
 0x453   :  { %828 = vtanh.f32 %v470_v58 }
 0x454   :  { %830 = vtanh.f32 %v503_v59 }
 0x458   :  { %v468_v61 = vpop.f32.mrf.mxu3  ;;  %v501_v62 = vpop.f32.mrf.mxu1 }
 0x459   :  { %v829_v63 = vpop.eup %828 }
 0x45a   :  { %v831_v0 = vpop.eup %830  ;;  %v505_v1 = vpack.c.bf16 %v829_v63, %v829_v63  ;;  %v659_v63 = vperm.slane %v960_v47, 4 }
 0x45b   :  { %v538_v2 = vpack.c.bf16 %v831_v0, %v831_v0 }
 0x45c   :  { %763 = vmatmul.msk.bf16.vlgmr.msrb.gmra.mxu2 %vm186_vm9, %v505_v1  ;;  %764 = vmatmul.msk.bf16.vlgmr.msrb.gmra.mxu3 %vm186_vm9, %v505_v1 }
 0x45d   :  { %765 = vmatmul.msk.bf16.vlgmr.msra.gmra.mxu0 %vm186_vm9, %v538_v2 }
 0x4da   :  { %v551_v3 = vpop.f32.mrf.mxu0 }
 0x4df   :  { %v518_v4 = vpop.f32.mrf.mxu2  ;;  %v533_v5 = vpop.f32.mrf.mxu3 }
 0x4e0   :  { %v522_v6 = vadd.f32 %v518_v4, %v148_v53  ;;  %v537_v7 = vadd.f32 %v533_v5, %v963_v49  ;;  %v625_v53 = vperm.slane %v960_v47, 2 }
 0x4e2   :  { %832 = vtanh.f32 %v522_v6  ;;  %v555_v8 = vadd.f32 %v551_v3, %v537_v7  ;;  %v553_v9 = vpop.f32.mrf.mxu0 }
 0x4e4   :  { %834 = vtanh.f32 %v555_v8 }
 0x4e7   :  { %v520_v10 = vpop.f32.mrf.mxu2  ;;  %v535_v11 = vpop.f32.mrf.mxu3 }
 0x4e8   :  { %v833_v12 = vpop.eup %832 }
 0x4e9   :  { %v557_v13 = vpack.c.bf16 %v833_v12, %v833_v12 }
 0x4ea   :  { %v835_v14 = vpop.eup %834 }
 0x4eb   :  { %v575_v15 = vpack.c.bf16 %v835_v14, %v835_v14  ;;  %766 = vmatmul.msk.bf16.vlgmr.msra.gmra.mxu1 %vm186_vm9, %v557_v13 }
 0x4ed   :  { %767 = vmatmul.msk.bf16.vlgmr.msra.gmra.mxu2 %vm186_vm9, %v575_v15 }
 0x568   :  { %v570_v16 = vpop.f32.mrf.mxu1 }
 0x569   :  { %v574_v17 = vadd.f32 %v570_v16, %v963_v49 }
 0x570   :  { %v572_v18 = vpop.f32.mrf.mxu1  ;;  %v588_v19 = vpop.f32.mrf.mxu2 }
 0x571   :  { %v592_v20 = vadd.f32 %v588_v19, %v574_v17 }
 0x573   :  { %836 = vtanh.f32 %v592_v20 }
 0x574   :  { %838 = vrcp.f32 %v844_v24 }
 0x578   :  { %v590_v21 = vpop.f32.mrf.mxu2 }
 0x579   :  { %v837_v22 = vpop.eup %836 }
 0x57a   :  { %v594_v23 = vsel %vm186_vm9, %v837_v22, 0.0  ;;  %v839_v25 = vpop.eup %838 }
 0x57b   :  { %595 = vadd.xlane.f32.xlu2 %v594_v23  ;;  %v598_v26 = vmul.f32 32.0, %v839_v25  ;;  %vm602_vm10 = vweird.f32 %v839_v25 }
 0x57d   :  { %v599_v27 = vsub.f32 1.0, %v598_v26 }
 0x57f   :  { %v600_v28 = vmul.f32 %v839_v25, %v599_v27 }
 0x581   :  { %v601_v29 = vadd.f32 %v839_v25, %v600_v28 }
 0x583   :  { %v603_v30 = vsel %vm602_vm10, %v839_v25, %v601_v29 }
 0x5ee   :  { %v596_v31 = vpop.xlane.xlu2 %595 }
 0x5ef   :  { %v604_v49 = vmul.f32 %v603_v30, %v596_v31 }
 0x5f1   :  { %v605_v32 = vsub.f32 %v837_v22, %v604_v49 }
 0x5f3   :  { %v606_v33 = vmul.f32 %v605_v32, %v605_v32 }
 0x5f5   :  { %v607_v34 = vsel %vm186_vm9, %v606_v33, 0.0 }
 0x5f6   :  { %608 = vadd.xlane.f32.xlu0 %v607_v34 }
 0x669   :  { %v609_v40 = vpop.xlane.xlu0 %608 }
 0x66a   :  { %v610_v41 = vmul.f32 %v609_v40, %v603_v30 }
 0x66c   :  { %v611_v37 = vadd.f32 1e-05, %v610_v41 }
 0x66e   :  { %840 = vrsqrt.f32 %v611_v37  ;;  %vm618_vm12 = vweird.f32 %v611_v37 }
 0x674   :  { %v841_v45 = vpop.eup %840 }
 0x675   :  { %v613_v46 = vmul.f32 %v841_v45, %v611_v37  ;;  %vm619_vm11 = vweird.f32 %v841_v45 }
 0x676   :  { %vm620_vm13 = vmor %vm618_vm12, %vm619_vm11 }
 0x677   :  { %v614_v48 = vmul.f32 %v841_v45, %v613_v46 }
 0x679   :  { %v615_v50 = vmul.f32 0.5, %v614_v48 }
 0x67b   :  { %v616_v39 = vsub.f32 1.5, %v615_v50 }
 0x67d   :  { %v617_v43 = vmul.f32 %v841_v45, %v616_v39 }
 0x67f   :  { %v621_v51 = vsel %vm620_vm13, %v841_v45, %v617_v43 }
 0x680   :  { %v622_v52 = vmul.f32 %v621_v51, %v605_v32 }
 0x682   :  { %v624_v54 = vmul.f32 %v623_v44, %v622_v52 }
 0x684   :  { %v626_v55 = vadd.f32 %v625_v53, %v624_v54 }
 0x686   :  { %v627_v56 = vpack.c.bf16 %v626_v55, %v626_v55 }
 0x688   :  { %776 = vmatmul.msk.bf16.vlgmr.msra.gmra.mxu3 %vm186_vm9, %v627_v56 }
 0x70b   :  { %v653_v58 = vpop.f32.mrf.mxu3 }
 0x70c   :  { %v654_v59 = vadd.f32 %v653_v58, %v628_v57 }
 0x70e   :  { %v657_v60 = vmax.f32 %v654_v59, 0.0 }
 0x710   :  { %v658_v61 = vpack.c.bf16 %v657_v60, %v657_v60 }
 0x712   :  { %785 = vmatmul.msk.bf16.vlgmr.msrb.gmra.mxu0 %vm186_vm9, %v658_v61 }
 0x713   :  { %v655_v62 = vpop.f32.mrf.mxu3 }
 0x78f   :  { %v684_v0 = vpop.f32.mrf.mxu0 }
 0x790   :  { %v685_v1 = vadd.f32 %v684_v0, %v659_v63 }
 0x792   :  { %689 = vst.msk [vmem:[%s1043_s3] sm:$0xff] %vm688_vm14, %v685_v1 }
 0x797   :  { %v686_v2 = vpop.f32.mrf.mxu0 }

</bundles_post_ra>
